<compile_context>
chip_gen: v5e
topology: v5e:2x2
jax: 0.10.0
libtpu: 0.0.40
codegen_flags: <defaults>
</compile_context>

<pallas_src>
import jax
import jax.numpy as jnp
from jax.experimental import pallas as pl
from jax.experimental.pallas import tpu as pltpu


def _frozen_bn_kernel(x_ref, s_ref, b_ref, o_ref):
    # s_ref/b_ref are float32, shaped (tile_r, 1) or (1, tile_l); they
    # broadcast against the x tile.  FMA in f32, downcast on store.
    x = x_ref[...].astype(jnp.float32)
    o_ref[...] = (x * s_ref[...] + b_ref[...]).astype(o_ref.dtype)


def _vmem_budget_bytes():
    """Generation-aware scoped-VMEM budget (v7x: 64 MiB phys; v5e/v6e: 128)."""
    try:
        cap = pltpu.get_tpu_info().vmem_capacity_bytes
    except Exception:
        cap = 64 << 20  # conservative: v7x per-TensorCore capacity
    # Use at most half of physical VMEM as the scoped limit, capped at 48 MiB.
    return max(16 << 20, min(cap // 2, 48 << 20))


def _round_up(x, m):
    return -(-x // m) * m


def _frozen_bn_apply(x2d, s2d, b2d):
    """y = x * s + b over an (R, L) slab.  s2d/b2d are float32 and either
    (R, 1) (per-row, broadcast along lanes) or (1, L) (per-lane table)."""
    R, L = x2d.shape
    dt = x2d.dtype
    itemsize = jnp.dtype(dt).itemsize

    # Dtype-aware sublane multiple (f32: 8, bf16/f16: 16, int8/fp8: 32).
    sublane = {4: 8, 2: 16, 1: 32}.get(itemsize, 8)

    vmem_limit = _vmem_budget_bytes()
    # double-buffered (in + out) ~= 4 * block  ->  keep <= ~80% of the limit.
    max_block_bytes = vmem_limit // 5
    target_block_bytes = min(4 << 20, max_block_bytes)

    row_bytes = L * itemsize
    min_rows = min(R, sublane)  # smallest legal row block (or full extent)

    if row_bytes * min_rows <= max_block_bytes:
        # Full-row lane tiles: one contiguous HBM DMA per block.
        tile_l = L
        rows = (target_block_bytes // row_bytes) // sublane * sublane
        tile_r = min(R, max(min_rows, rows))
        # Megacore (v7x): keep the row ("parallel") axis at >= 2 blocks.
        if tile_r >= R and R >= 2 * sublane:
            nblk = 4 if R >= 4 * sublane else 2
            cand = _round_up(-(-R // nblk), sublane)
            if cand < R:
                tile_r = cand
    else:
        # A single row does not fit the budget: split lanes (128-aligned).
        tile_r = min_rows
        if L % 128 == 0:
            tile_l = max(
                128,
                min(L, (target_block_bytes // (itemsize * tile_r)) // 128 * 128),
            )
        else:
            # TODO(synk): non-128-aligned lane splits would need padding or
            # pl.Element indexing; fall back to the full (oversized) row.
            tile_l = L

    grid = (pl.cdiv(R, tile_r), pl.cdiv(L, tile_l))

    if s2d.shape[0] == 1:                 # per-lane table (1, L)
        sb_block = (1, tile_l)
        sb_map = lambda i, j: (0, j)
    else:                                 # per-row (R, 1)
        sb_block = (tile_r, 1)
        sb_map = lambda i, j: (i, 0)

    cost = pl.CostEstimate(
        flops=2 * R * L,
        transcendentals=0,
        bytes_accessed=2 * R * L * itemsize + 2 * s2d.size * 4,
    )

    return pl.pallas_call(
        _frozen_bn_kernel,
        out_shape=jax.ShapeDtypeStruct((R, L), dt),
        grid_spec=pltpu.PrefetchScalarGridSpec(
            num_scalar_prefetch=0,
            grid=grid,
            in_specs=[
                pl.BlockSpec((tile_r, tile_l), lambda i, j: (i, j)),
                pl.BlockSpec(sb_block, sb_map),
                pl.BlockSpec(sb_block, sb_map),
            ],
            out_specs=pl.BlockSpec((tile_r, tile_l), lambda i, j: (i, j)),
        ),
        compiler_params=pltpu.CompilerParams(
            dimension_semantics=("parallel", "parallel"),
            vmem_limit_bytes=vmem_limit,
        ),
        cost_estimate=cost,
    )(x2d, s2d, b2d)


class FrozenBatchNorm2d:
    """Frozen BN: fixed running stats and affine params.  epsilon defaults to
    0.0 to match the reference module (pass a non-zero epsilon for real
    checkpoints where running_var may be ~0)."""

    def __init__(self, n, epsilon=0.0):
        self.n = n
        self.epsilon = epsilon
        # Deterministic "frozen" buffers (same shapes as the PyTorch module).
        # Non-trivial values so the kernel is actually exercised; running_var
        # is strictly positive so rsqrt is finite even with epsilon=0.
        key = jax.random.PRNGKey(42)
        k_w, k_b, k_m, k_v = jax.random.split(key, 4)
        self.weight = jnp.ones((n,), jnp.float32) + 0.1 * jax.random.normal(k_w, (n,))
        self.bias = 0.1 * jax.random.normal(k_b, (n,))
        self.running_mean = 0.1 * jax.random.normal(k_m, (n,))
        self.running_var = jnp.ones((n,), jnp.float32) + 0.05 * jax.random.uniform(k_v, (n,))

    def _folded_scale_bias(self):
        # Fold in float32; the kernel also FMAs in float32 and downcasts on
        # store, so low-precision inputs keep the f32 fold precision.
        scale32 = self.weight * jax.lax.rsqrt(
            self.running_var + jnp.float32(self.epsilon)
        )
        bias32 = self.bias - self.running_mean * scale32
        return scale32, bias32

    def __call__(self, x):
        N, C, H, W = x.shape
        HW = H * W
        scale32, bias32 = self._folded_scale_bias()

        if HW % 128 == 0:
            # Already lane-dense: rows are (n, c) pairs, lanes are spatial.
            R = N * C
            x2d = x.reshape(R, HW)
            # O(R) bytes; negligible next to the O(R*HW) x traffic.
            s2d = jnp.tile(scale32, N).reshape(R, 1)
            b2d = jnp.tile(bias32, N).reshape(R, 1)
        else:
            # Small / non-128-multiple spatial (7x7=49, 14x14=196, ...):
            # repack lane-dense as (N, C*H*W) with a per-lane scale/bias
            # table so stores are full-width instead of masked vst.msk.
            L = C * HW
            x2d = x.reshape(N, L)
            s2d = jnp.repeat(scale32, HW).reshape(1, L)
            b2d = jnp.repeat(bias32, HW).reshape(1, L)

        out2d = _frozen_bn_apply(x2d, s2d, b2d)
        return out2d.reshape(N, C, H, W)


def _reference(mod: FrozenBatchNorm2d, x):
    scale32, bias32 = mod._folded_scale_bias()
    y = (x.astype(jnp.float32) * scale32.reshape(1, -1, 1, 1)
         + bias32.reshape(1, -1, 1, 1))
    return y.astype(x.dtype)


if __name__ == "__main__":
    # Main check: 128-aligned spatial (per-row broadcast path).
    N, C, H, W = 2, 4, 16, 16
    x = jax.random.normal(jax.random.PRNGKey(0), (N, C, H, W), dtype=jnp.float32)
    bn = FrozenBatchNorm2d(C, epsilon=0.0)
    out = jax.block_until_ready(bn(x))
    ref = _reference(bn, x)
    assert out.shape == x.shape and out.dtype == x.dtype
    assert jnp.allclose(out, ref, atol=1e-5, rtol=1e-5)

    # Secondary check: non-128-multiple spatial (lane-dense path, HW=49).
    x2 = jax.random.normal(jax.random.PRNGKey(1), (2, 4, 7, 7), dtype=jnp.float32)
    out2 = jax.block_until_ready(bn(x2))
    ref2 = _reference(bn, x2)
    assert jnp.allclose(out2, ref2, atol=1e-5, rtol=1e-5)

    print("KERNEL_OK")
</pallas_src>

<mosaic_0001>
module attributes {stable_mosaic.version = 11 : i64} {
  func.func @_frozen_bn_kernel(%arg0: i32, %arg1: i32, %arg2: memref<8x256xf32, #tpu.memory_space<vmem>>, %arg3: memref<8x1xf32, #tpu.memory_space<vmem>>, %arg4: memref<8x1xf32, #tpu.memory_space<vmem>>, %arg5: memref<8x256xf32, #tpu.memory_space<vmem>>) attributes {dimension_semantics = [#tpu.dimension_semantics<parallel>, #tpu.dimension_semantics<parallel>], iteration_bounds = array<i64: 1, 1>, scalar_prefetch = 0 : i64, scratch_operands = 0 : i64, tpu.core_type = #tpu.core_type<tc>, window_params = [{transform_indices = @transform_0, window_bounds = array<i64: 8, 256>}, {transform_indices = @transform_1, window_bounds = array<i64: 8, 1>}, {transform_indices = @transform_2, window_bounds = array<i64: 8, 1>}, {transform_indices = @transform_3, window_bounds = array<i64: 8, 256>}]} {
    %c0 = arith.constant 0 : index
    %c0_0 = arith.constant 0 : index
    %0 = vector.load %arg2[%c0, %c0_0] : memref<8x256xf32, #tpu.memory_space<vmem>>, vector<8x256xf32>
    %c0_1 = arith.constant 0 : index
    %c0_2 = arith.constant 0 : index
    %1 = vector.load %arg3[%c0_1, %c0_2] : memref<8x1xf32, #tpu.memory_space<vmem>>, vector<8x1xf32>
    %2 = vector.broadcast %1 : vector<8x1xf32> to vector<8x256xf32>
    %3 = arith.mulf %0, %2 : vector<8x256xf32>
    %c0_3 = arith.constant 0 : index
    %c0_4 = arith.constant 0 : index
    %4 = vector.load %arg4[%c0_3, %c0_4] : memref<8x1xf32, #tpu.memory_space<vmem>>, vector<8x1xf32>
    %5 = vector.broadcast %4 : vector<8x1xf32> to vector<8x256xf32>
    %6 = arith.addf %3, %5 : vector<8x256xf32>
    %c0_5 = arith.constant 0 : index
    %c0_6 = arith.constant 0 : index
    %7 = vector.load %arg5[%c0_5, %c0_6] : memref<8x256xf32, #tpu.memory_space<vmem>>, vector<8x256xf32>
    tpu.vector_store %arg5[%c0_5, %c0_6], %6 {strides = array<i32>} : memref<8x256xf32, #tpu.memory_space<vmem>>, vector<8x256xf32>,
    return
  }
  func.func @transform_0(%arg0: i32, %arg1: i32) -> (i32, i32) {
    %c0_i32 = arith.constant 0 : i32
    return %arg0, %arg1 : i32, i32
  }
  func.func @transform_1(%arg0: i32, %arg1: i32) -> (i32, i32) {
    %c0_i32 = arith.constant 0 : i32
    %c0_i32_0 = arith.constant 0 : i32
    return %arg0, %c0_i32 : i32, i32
  }
  func.func @transform_2(%arg0: i32, %arg1: i32) -> (i32, i32) {
    %c0_i32 = arith.constant 0 : i32
    %c0_i32_0 = arith.constant 0 : i32
    return %arg0, %c0_i32 : i32, i32
  }
  func.func @transform_3(%arg0: i32, %arg1: i32) -> (i32, i32) {
    %c0_i32 = arith.constant 0 : i32
    return %arg0, %arg1 : i32, i32
  }
}

</mosaic_0001>

<bundles_post_ra>
// kernel: tpu_custom_call.1
= control target key start
LH: loop header
LB: loop body
LE: loop exit
PB: predicated region body
PF: predicated region fallthrough
CT: control target
= control target key end

     0   :  { %s117_s0 = inlined_call_operand.vmem [shape: f32[8,256], index: 0, kind: input, shape index: {}]   ;;  %s118_s1 = inlined_call_operand.vmem [shape: f32[8,1], index: 1, kind: input, shape index: {}]   ;;  %s119_s2 = inlined_call_operand.vmem [shape: f32[8,1], index: 2, kind: input, shape index: {}]   ;;  %s120_s3 = inlined_call_operand.hbm [shape: f32[8,256], index: 3, kind: output, shape index: {}]  }
   0x1   :  { %v17_v0 = vld [vmem:[%s118_s1] sm:$0xff] }
   0x2   :  { %8 = vsyncpa [#allocation3], 0  ;;  %v80_v1 = vmov 0   ;;  %v25_v2 = vld [vmem:[%s119_s2] sm:$0xff]  ;;  %v16_v5 = vld [vmem:[%s117_s0 + $0x8] sm:$0xff]  ;;  %s81_s1 = smov [#allocation2]  }
   0x3   :  { %53 = vset.pattern.permute.xlu0 %v80_v1  ;;  %v15_v4 = vld [vmem:[%s117_s0] sm:$0xff]  ;;  %s40_s20 = sshll.u32 %s81_s1, 4  ;;  %s42_s23 = sshll.u32 %s120_s3, 4  ;;  %s41_s20 = int_to_ptr.vmem [resolvable:$true] %s40_s20  ;;  %s43_s23 = int_to_ptr.hbm [resolvable:$true] %s42_s23 }
   0x4   :  { %20 = vperm.xlu0 %53, %v17_v0  }
   0xc   :  { %28 = vperm.xlu0 %53, %v25_v2  }
  0x76   :  { %v21_v3 = vpop.permute.xlu0 %20 }
  0x77   :  { %v23_v6 = vmul.f32 %v21_v3, %v15_v4  ;;  %v24_v7 = vmul.f32 %v21_v3, %v16_v5 }
  0x7e   :  { %v29_v8 = vpop.permute.xlu0 %28 }
  0x7f   :  { %v31_v9 = vadd.f32 %v29_v8, %v23_v6  ;;  %v32_v10 = vadd.f32 %v29_v8, %v24_v7 }
  0x81   :  { %33 = vst [vmem:[#allocation2] sm:$0xff] %v31_v9 }
  0x82   :  { %34 = vst [vmem:[#allocation2 + $0x8] sm:$0xff] %v32_v10 }
  0x83   :  { %45 = dma.vmem_to_hbm [thread:$0]  %s41_s20, 256, %s43_s23, [#allocation3]  }
  0x84   :  { %78 = dma.done.wait [#allocation3], 256  }
  0x85   :  { %79 = vsyncadd [#allocation3], 4294967040 }
  0x86   :  { %50 = vsyncpa [#allocation3], 1 }

</bundles_post_ra>
